<compile_context>
chip_gen: v6e
topology: v6e:2x2x1
jax: 0.10.0
libtpu: 0.0.40
codegen_flags: <defaults>
</compile_context>

<pallas_src>
import functools

import jax
import jax.numpy as jnp
from jax.experimental import pallas as pl
from jax.experimental.pallas import tpu as pltpu


# ---------------------------------------------------------------------------
# Kernels
# ---------------------------------------------------------------------------
def _ca_fused_kernel(x_ref, w1t_ref, w2_ref, o_ref, *, inv_hw):
    # x_ref  : (1, C, HW)  one batch element, channels on sublanes, HW on lanes
    # w1t_ref: (C, Cr)     conv1 weight transposed
    # w2_ref : (C, Cr)     conv2 weight (PyTorch layout, untransposed)
    # o_ref  : (1, C, HW)
    x = x_ref[0]                                                    # (C, HW)
    # global average pool over spatial positions (f32 accumulation)
    pooled = jnp.sum(x.astype(jnp.float32), axis=-1, keepdims=True) * inv_hw  # (C,1)
    # 1x1 conv #1 + ReLU on the VPU: (C,Cr)*(C,1) -> reduce over C -> (1,Cr)
    h = jnp.maximum(jnp.sum(w1t_ref[...] * pooled, axis=0, keepdims=True), 0.0)
    # 1x1 conv #2 + sigmoid: (C,Cr)*(1,Cr) -> reduce over Cr -> (C,1)
    attn = jax.nn.sigmoid(jnp.sum(w2_ref[...] * h, axis=-1, keepdims=True))
    # per-channel scale, broadcast along lanes; multiply in the input dtype so
    # bf16 inputs stay bf16 on the VPU (no f32 promotion of the full slab).
    o_ref[0] = (x * attn.astype(x.dtype)).astype(o_ref.dtype)


def _pool_kernel(x_ref, sum_ref, acc_ref, *, hw, tile):
    # Tiled spatial-sum reduction.  grid = (N, num_tiles); reduction axis last.
    # Accumulates a lane-aligned (C, 128) f32 partial with pure VPU adds; the
    # single cross-lane reduce happens once in the epilogue.
    t = pl.program_id(1)
    last = pl.num_programs(1) - 1

    @pl.when(t == 0)
    def _():
        acc_ref[...] = jnp.zeros_like(acc_ref)

    x = x_ref[0].astype(jnp.float32)                                # (C, tile)

    def accumulate(xv):
        part = xv[:, 0:128]
        for i in range(1, tile // 128):                 # static unrolled, VPU-only
            part = part + xv[:, i * 128:(i + 1) * 128]
        acc_ref[...] += part

    n_tiles = pl.cdiv(hw, tile)                         # static
    rem = hw - (n_tiles - 1) * tile                     # valid lanes in last tile
    if rem == tile:
        # H*W is a multiple of the tile: no ragged tail, no masking anywhere.
        accumulate(x)
    else:
        # Out-of-bounds lanes of the final block contain unspecified data and
        # MUST be masked before accumulating (reads are not masked by Pallas).
        @pl.when(t != last)
        def _():
            accumulate(x)

        @pl.when(t == last)
        def _():
            lane = jax.lax.broadcasted_iota(jnp.int32, x.shape, 1)
            accumulate(jnp.where(lane < rem, x, 0.0))

    @pl.when(t == last)
    def _():
        sum_ref[0] = jnp.sum(acc_ref[...], axis=-1, keepdims=True)  # (C, 1)


def _scale_kernel(x_ref, attn_ref, o_ref):
    # x_ref: (1, C, T), attn_ref: (1, C, 1) -> broadcast multiply along lanes.
    # attn is pre-cast to x.dtype, so bf16 inputs multiply natively in bf16.
    # The ragged final output block is write-masked automatically.
    o_ref[0] = (x_ref[0] * attn_ref[0]).astype(o_ref.dtype)


# ---------------------------------------------------------------------------
# Wrapper
# ---------------------------------------------------------------------------
def _default_vmem_budget_bytes():
    """Generation-aware fused-path VMEM budget with ~28% headroom:
    ~46 MiB on v7x (64 MiB / TensorCore), ~92 MiB on v5e/v6e (128 MiB)."""
    try:
        cap = int(pltpu.get_tpu_info().vmem_capacity_bytes)
    except Exception:
        cap = 64 << 20            # conservative fallback (v7x-sized VMEM)
    return int(cap * 0.72)


def ca_layer(x_nchw, w1, w2, *, vmem_budget_bytes=None, max_tile=16384,
             force_tiled=False):
    """CALayer forward.

    x_nchw: (N, C, H, W); w1: (Cr, C); w2: (C, Cr)  (PyTorch 1x1-conv weights
    with the trailing 1x1 spatial dims squeezed, bias=False)."""
    N, C, H, W = x_nchw.shape
    Cr = w1.shape[0]
    HW = H * W

    x = x_nchw.reshape(N, C, HW)          # pure reshape of NCHW -- no transpose
    w1 = jnp.asarray(w1)                  # (Cr, C)
    w2 = jnp.asarray(w2)                  # (C, Cr)
    inv_hw = 1.0 / float(HW)

    if vmem_budget_bytes is None:
        vmem_budget_bytes = _default_vmem_budget_bytes()

    itemsize = jnp.dtype(x.dtype).itemsize
    slab_in = C * HW * itemsize
    # 2x double-buffered input + 2x double-buffered output + one f32 working
    # copy (pooling cast when x is bf16) + slack for weights / temporaries.
    fused_need = 4 * slab_in + C * HW * 4 + (1 << 20)
    fits_vmem = fused_need <= vmem_budget_bytes

    if fits_vmem and not force_tiled:
        # ---- fused whole-slab path: optimal 1 HBM read + 1 HBM write ----
        w1t = w1.T                                                   # (C, Cr)
        out = pl.pallas_call(
            functools.partial(_ca_fused_kernel, inv_hw=inv_hw),
            out_shape=jax.ShapeDtypeStruct((N, C, HW), x.dtype),
            grid_spec=pltpu.PrefetchScalarGridSpec(
                num_scalar_prefetch=0,
                grid=(N,),
                in_specs=[
                    pl.BlockSpec((1, C, HW), lambda n: (n, 0, 0)),
                    pl.BlockSpec((C, Cr), lambda n: (0, 0)),
                    pl.BlockSpec((C, Cr), lambda n: (0, 0)),
                ],
                out_specs=pl.BlockSpec((1, C, HW), lambda n: (n, 0, 0)),
            ),
            compiler_params=pltpu.CompilerParams(
                dimension_semantics=("parallel",),
                vmem_limit_bytes=int(vmem_budget_bytes)),
        )(x, w1t, w2)
        return out.reshape(N, C, H, W)

    # ---- tiled two-kernel path for large feature maps (pad-free) ----
    # Grid over cdiv(HW, tile); no jnp.pad / output slice (each would cost a
    # full extra HBM read+write of the tensor).  The ragged final tile is
    # masked inside the pooling kernel; the scale pass is write-masked.
    tile = min(int(max_tile), ((HW + 127) // 128) * 128)   # lane-aligned tile
    n_tiles = pl.cdiv(HW, tile)
    # ~8-10 MiB of pipelined VMEM per pass at tile=16384; 48 MiB limit is safe
    # on every generation (v7x has 64 MiB per TensorCore).
    tiled_vmem_limit = 48 << 20

    # Pass 1: tiled spatial sums -> (N, C, 1) f32.
    sums = pl.pallas_call(
        functools.partial(_pool_kernel, hw=HW, tile=tile),
        out_shape=jax.ShapeDtypeStruct((N, C, 1), jnp.float32),
        grid_spec=pltpu.PrefetchScalarGridSpec(
            num_scalar_prefetch=0,
            grid=(N, n_tiles),
            in_specs=[pl.BlockSpec((1, C, tile), lambda n, t: (n, 0, t))],
            out_specs=pl.BlockSpec((1, C, 1), lambda n, t: (n, 0, 0)),
            scratch_shapes=[pltpu.VMEM((C, 128), jnp.float32)],
        ),
        compiler_params=pltpu.CompilerParams(
            dimension_semantics=("parallel", "arbitrary"),
            vmem_limit_bytes=tiled_vmem_limit),
    )(x)
    # NOTE: on v7x with N == 1 this pooling pass runs on a single TensorCore
    # (only the N axis is parallel).  Splitting the tile axis across cores with
    # per-core partial sums is possible but secondary (pass is HBM-bound).

    # Tiny C -> C/r -> C channel MLP + sigmoid in plain JAX (~128 FLOPs/image).
    pooled = sums[:, :, 0] * inv_hw                                   # (N, C)
    h = jnp.maximum(pooled @ w1.T, 0.0)                               # (N, Cr)
    attn = jax.nn.sigmoid(h @ w2.T).astype(x.dtype)[:, :, None]       # (N, C, 1)

    # Pass 2: fully parallel tiled broadcast multiply (1R + 1W of x).
    out = pl.pallas_call(
        _scale_kernel,
        out_shape=jax.ShapeDtypeStruct((N, C, HW), x.dtype),
        grid_spec=pltpu.PrefetchScalarGridSpec(
            num_scalar_prefetch=0,
            grid=(N, n_tiles),
            in_specs=[
                pl.BlockSpec((1, C, tile), lambda n, t: (n, 0, t)),
                pl.BlockSpec((1, C, 1), lambda n, t: (n, 0, 0)),
            ],
            out_specs=pl.BlockSpec((1, C, tile), lambda n, t: (n, 0, t)),
        ),
        compiler_params=pltpu.CompilerParams(
            dimension_semantics=("parallel", "parallel"),
            vmem_limit_bytes=tiled_vmem_limit),
    )(x, attn)
    return out.reshape(N, C, H, W)


# ---------------------------------------------------------------------------
# Pure-JAX reference (matches PyTorch semantics)
# ---------------------------------------------------------------------------
def _reference(x_nchw, w1, w2):
    pooled = jnp.mean(x_nchw, axis=(2, 3))                       # (N, C)
    h = jnp.maximum(pooled @ w1.T, 0.0)                          # (N, Cr)
    attn = jax.nn.sigmoid(h @ w2.T)                              # (N, C)
    return x_nchw * attn[:, :, None, None]


if __name__ == "__main__":
    # Module config: channel=32, reduction=16 -> hidden Cr=2, bias=False
    C, reduction = 32, 16
    Cr = C // reduction

    key = jax.random.PRNGKey(0)
    kx, k1, k2, kx2 = jax.random.split(key, 4)
    w1 = jax.random.normal(k1, (Cr, C), dtype=jnp.float32) * 0.1   # (out=Cr, in=C)
    w2 = jax.random.normal(k2, (C, Cr), dtype=jnp.float32) * 0.1   # (out=C, in=Cr)

    # --- test 1: fused whole-slab path (N=2, C=32, 16x16) ---
    N, H, W = 2, 16, 16
    x = jax.random.normal(kx, (N, C, H, W), dtype=jnp.float32)
    out = jax.block_until_ready(ca_layer(x, w1, w2))
    ref = _reference(x, w1, w2)
    assert out.shape == (N, C, H, W)
    assert jnp.allclose(out, ref, atol=1e-5, rtol=1e-5), "fused path mismatch"

    # --- test 2: tiled path, exact multiple of the tile (no mask branch) ---
    out_t = jax.block_until_ready(
        ca_layer(x, w1, w2, force_tiled=True, max_tile=128))       # 256 -> 2 tiles
    assert jnp.allclose(out_t, ref, atol=1e-5, rtol=1e-5), "tiled exact mismatch"

    # --- test 3: tiled path, multi-tile with ragged (masked) final tile ---
    H2, W2 = 18, 18                        # HW=324 -> 3 tiles of 128, last has 68 lanes
    x2 = jax.random.normal(kx2, (N, C, H2, W2), dtype=jnp.float32)
    out2 = jax.block_until_ready(
        ca_layer(x2, w1, w2, force_tiled=True, max_tile=128))
    ref2 = _reference(x2, w1, w2)
    assert out2.shape == (N, C, H2, W2)
    assert jnp.allclose(out2, ref2, atol=1e-5, rtol=1e-5), "tiled ragged mismatch"

    # --- test 4: tiled path, single ragged tile (default max_tile) ---
    out3 = jax.block_until_ready(ca_layer(x2, w1, w2, force_tiled=True))
    assert jnp.allclose(out3, ref2, atol=1e-5, rtol=1e-5), "tiled single-tile mismatch"

    print("KERNEL_OK")
</pallas_src>

<mosaic_0001>
module attributes {stable_mosaic.version = 11 : i64} {
  func.func @_ca_fused_kernel(%arg0: i32, %arg1: memref<1x32x256xf32, #tpu.memory_space<vmem>>, %arg2: memref<32x2xf32, #tpu.memory_space<vmem>>, %arg3: memref<32x2xf32, #tpu.memory_space<vmem>>, %arg4: memref<1x32x256xf32, #tpu.memory_space<vmem>>) attributes {dimension_semantics = [#tpu.dimension_semantics<parallel>], iteration_bounds = array<i64: 2>, scalar_prefetch = 0 : i64, scratch_operands = 0 : i64, tpu.core_type = #tpu.core_type<tc>, window_params = [{transform_indices = @transform_0, window_bounds = array<i64: 1, 32, 256>}, {pipeline_mode = #tpu.pipeline_mode<synchronous>, transform_indices = @transform_1, window_bounds = array<i64: 32, 2>}, {pipeline_mode = #tpu.pipeline_mode<synchronous>, transform_indices = @transform_2, window_bounds = array<i64: 32, 2>}, {transform_indices = @transform_3, window_bounds = array<i64: 1, 32, 256>}]} {
    %c0 = arith.constant 0 : index
    %c0_0 = arith.constant 0 : index
    %c0_1 = arith.constant 0 : index
    %0 = vector.load %arg1[%c0, %c0_0, %c0_1] : memref<1x32x256xf32, #tpu.memory_space<vmem>>, vector<1x32x256xf32>
    %1 = vector.shape_cast %0 : vector<1x32x256xf32> to vector<32x256xf32>
    %cst = arith.constant dense<0.000000e+00> : vector<32xf32>
    %2 = vector.multi_reduction <add>, %1, %cst [1] : vector<32x256xf32> to vector<32xf32>
    %3 = vector.shape_cast %2 : vector<32xf32> to vector<32x1xf32>
    %cst_2 = arith.constant 3.906250e-03 : f32
    %4 = vector.broadcast %cst_2 : f32 to vector<32x1xf32>
    %5 = arith.mulf %3, %4 : vector<32x1xf32>
    %c0_3 = arith.constant 0 : index
    %c0_4 = arith.constant 0 : index
    %6 = vector.load %arg2[%c0_3, %c0_4] : memref<32x2xf32, #tpu.memory_space<vmem>>, vector<32x2xf32>
    %7 = vector.broadcast %5 : vector<32x1xf32> to vector<32x2xf32>
    %8 = arith.mulf %6, %7 : vector<32x2xf32>
    %cst_5 = arith.constant dense<0.000000e+00> : vector<2xf32>
    %9 = vector.multi_reduction <add>, %8, %cst_5 [0] : vector<32x2xf32> to vector<2xf32>
    %10 = vector.shape_cast %9 : vector<2xf32> to vector<1x2xf32>
    %cst_6 = arith.constant 0.000000e+00 : f32
    %11 = vector.broadcast %cst_6 : f32 to vector<1x2xf32>
    %12 = arith.maximumf %10, %11 : vector<1x2xf32>
    %c0_7 = arith.constant 0 : index
    %c0_8 = arith.constant 0 : index
    %13 = vector.load %arg3[%c0_7, %c0_8] : memref<32x2xf32, #tpu.memory_space<vmem>>, vector<32x2xf32>
    %14 = vector.broadcast %12 : vector<1x2xf32> to vector<32x2xf32>
    %15 = arith.mulf %13, %14 : vector<32x2xf32>
    %cst_9 = arith.constant dense<0.000000e+00> : vector<32xf32>
    %16 = vector.multi_reduction <add>, %15, %cst_9 [1] : vector<32x2xf32> to vector<32xf32>
    %17 = vector.shape_cast %16 : vector<32xf32> to vector<32x1xf32>
    %18 = arith.negf %17 : vector<32x1xf32>
    %19 = math.exp %18 : vector<32x1xf32>
    %cst_10 = arith.constant 1.000000e+00 : f32
    %20 = vector.broadcast %cst_10 : f32 to vector<32x1xf32>
    %21 = arith.addf %20, %19 : vector<32x1xf32>
    %22 = arith.divf %20, %21 : vector<32x1xf32>
    %23 = vector.broadcast %22 : vector<32x1xf32> to vector<32x256xf32>
    %24 = arith.mulf %1, %23 : vector<32x256xf32>
    %c0_11 = arith.constant 0 : index
    %c0_12 = arith.constant 0 : index
    %c0_13 = arith.constant 0 : index
    %25 = vector.load %arg4[%c0_11, %c0_12, %c0_13] : memref<1x32x256xf32, #tpu.memory_space<vmem>>, vector<1x32x256xf32>
    %26 = vector.shape_cast %25 : vector<1x32x256xf32> to vector<32x256xf32>
    %27 = vector.shape_cast %24 : vector<32x256xf32> to vector<1x32x256xf32>
    tpu.vector_store %arg4[%c0_11, %c0_12, %c0_13], %27 {strides = array<i32>} : memref<1x32x256xf32, #tpu.memory_space<vmem>>, vector<1x32x256xf32>,
    return
  }
  func.func @transform_0(%arg0: i32) -> (i32, i32, i32) {
    %c0_i32 = arith.constant 0 : i32
    %c0_i32_0 = arith.constant 0 : i32
    %c0_i32_1 = arith.constant 0 : i32
    return %arg0, %c0_i32, %c0_i32_0 : i32, i32, i32
  }
  func.func @transform_1(%arg0: i32) -> (i32, i32) {
    %c0_i32 = arith.constant 0 : i32
    %c0_i32_0 = arith.constant 0 : i32
    %c0_i32_1 = arith.constant 0 : i32
    return %c0_i32, %c0_i32_0 : i32, i32
  }
  func.func @transform_2(%arg0: i32) -> (i32, i32) {
    %c0_i32 = arith.constant 0 : i32
    %c0_i32_0 = arith.constant 0 : i32
    %c0_i32_1 = arith.constant 0 : i32
    return %c0_i32, %c0_i32_0 : i32, i32
  }
  func.func @transform_3(%arg0: i32) -> (i32, i32, i32) {
    %c0_i32 = arith.constant 0 : i32
    %c0_i32_0 = arith.constant 0 : i32
    %c0_i32_1 = arith.constant 0 : i32
    return %arg0, %c0_i32, %c0_i32_0 : i32, i32, i32
  }
}

</mosaic_0001>

<bundles_post_ra>
// kernel: tpu_custom_call.1
= control target key start
LH: loop header
LB: loop body
LE: loop exit
PB: predicated region body
PF: predicated region fallthrough
CT: control target
= control target key end

     0   :  { %8 = vsyncpa [#allocation3], 0  ;;  %s811_s0 = inlined_call_operand.hbm [shape: f32[2,32,256], index: 0, kind: input, shape index: {}]   ;;  %s812_s1 = inlined_call_operand.vmem [shape: f32[32,2], index: 1, kind: input, shape index: {}]   ;;  %s813_s2 = inlined_call_operand.vmem [shape: f32[32,2], index: 2, kind: input, shape index: {}]   ;;  %s814_s3 = inlined_call_operand.hbm [shape: f32[2,32,256], index: 3, kind: output, shape index: {}]  }
   0x1   :  { %10 = vsyncpa [#allocation3 + $0x1], 0 }
   0x2   :  { %11 = vsyncpa [#allocation4], 0 }
   0x3   :  { %13 = vsyncpa [#allocation4 + $0x1], 0  ;;  %s589_s12 = smov 0   ;;  %s591_s13 = smov 0  }
   0x4   :  { %s593_s14 = smov 0   ;;  %s595_s15 = smov 0  }
   0x5 LB: > { %s610_s16 = sadd.s32 4294967295, %s561_s15   ;;  %s383_s17 = sadd.s32 4294967294, %s561_s15   ;;  %s561_s15 = sphi %s595_s15, %s829_s15   ;;  %s557_s14 = sphi %s593_s14, %s828_s14   ;;  %s553_s13 = sphi %s591_s13, %s827_s13   ;;  %s549_s12 = sphi %s589_s12, %s826_s12  }
   0x6   : > { %s614_s18 = sadd.s32 1, %s561_s15   ;;  %s26_s19 = sadd.s32 1, %s557_s14 }
   0x7   : > { %s23_s20 = ssub.s32 %s561_s15, %s614_s18  ;;  %p33_p0 = scmp.ne.s32.totalorder %s557_s14, %s553_s13 }
   0x8   : > { %p24_p1 = scmp.eq.s32.totalorder %s23_s20, 0  ;;  %p34_p2 = scmp.eq.s32.totalorder %s561_s15, 0 }
   0x9   : > { %p39_p3 = scmp.ne.s32.totalorder %s553_s13, %s549_s12  ;;  %p40_p4 = scmp.eq.s32.totalorder %s610_s16, 0 }
   0xa   : > { %s626_s21 = scalar_select %p24_p1, %s557_s14, %s26_s19  }
   0xb   : > { %p628_p5 = por %p34_p2, %p33_p0  ;;  %p632_p6 = por %p40_p4, %p39_p3 }
   0xc   : > { %p105_p7 = scmp.eq.s32.totalorder %s610_s16, 1  ;;  %p111_p8 = scmp.eq.s32.totalorder %s383_s17, 1 }
   0xd   : > { %s818_s23 = scalar_select %p632_p6, 1, 0 }
   0xe   : > { %p415_p10 = scmp.lt.s32.totalorder %s561_s15, 2  ;;  %p639_p11 = por %p105_p7, %p33_p0 }
   0xf   : > { %p643_p12 = por %p111_p8, %p39_p3  ;;  %s137_s26 = sand.u32 1, %s557_s14  }
  0x10   : > { %s819_s24 = scalar_select %p639_p11, 1, 0 }
  0x11   : > { %s820_s25 = scalar_select %p643_p12, 1, 0 }
  0x12   : > { %s401_s27 = sshll.u32 %s561_s15, 10  ;;  %s386_s28 = sshll.u32 %s137_s26, 6 }
  0x13   : > { %s652_s4 = scalar_lea.hbm %s811_s0, %s401_s27  ;;  %s141_s5 = scalar_lea.vmem [#allocation2], %s386_s28 }
  0x14   : > { %s148_s6 = sshll.u32 %s141_s5, 4  ;;  %p656_p13 = pnand %p415_p10, %p628_p5  ;;  %s660_s6 = int_to_ptr.vmem [resolvable:$true] %s148_s6 }
  0x15   : > { %s662_s8 = scalar_lea.sflag [#allocation3], %s137_s26  ;;  %s469_s9 = scalar_lea.hbm %s652_s4, 1024 }
  0x16   : > { %p470_p0 = scmp.ne.s32.totalorder %s652_s4, %s469_s9  ;;  %p471_p1 = pneg %p656_p13 }
  0x17   : > { %s474_s17 = scalar_lea.hbm %s811_s0, 2048  ;;  %p475_p4 = scmp.lt.s32.totalorder %s652_s4, %s811_s0 }
  0x18   : > { %p472_p2 = pnand %p471_p1, %p470_p0  ;;  %p476_p5 = scmp.lt.s32.totalorder %s474_s17, %s469_s9 }
  0x1a   : > { %p473_p3 = pneg %p472_p2  ;;  %p477_p7 = por %p476_p5, %p475_p4 }
  0x1c   : > { %p478_p8 = pnand %p477_p7, %p473_p3 }
  0x1e   : > { %481 = shalt.err (!%p478_p8)
}
  0x1f   : > { %s482_s22 = scalar_lea.vmem %s660_s6, 1024  ;;  %s563_s26 = smov [#allocation2]  }
  0x20   : > { %p483_p10 = scmp.ne.s32.totalorder %s660_s6, %s482_s22  ;;  %s487_s27 = sshll.u32 %s563_s26, 4  ;;  %s488_s27 = int_to_ptr.vmem [resolvable:$false] %s487_s27 }
  0x21   : > { %s489_s28 = scalar_lea.vmem %s488_s27, 2048  ;;  %p490_p2 = scmp.lt.s32.totalorder %s660_s6, %s488_s27 }
  0x22   : > { %p485_p9 = pnand %p483_p10, %p471_p1  ;;  %p491_p12 = scmp.lt.s32.totalorder %s489_s28, %s482_s22 }
  0x24   : > { %p486_p0 = pneg %p485_p9  ;;  %p492_p11 = por %p491_p12, %p490_p2 }
  0x26   : > { %p493_p6 = pnand %p492_p11, %p486_p0 }
  0x28   : > { %496 = shalt.err (!%p493_p6)
}
  0x29   : > { %s564_s29 = smov 256   ;;  %s565_s30 = smov 16  }
  0x2a   : > { %410 = dma.hbm_to_vmem [thread:$0]  (!%p656_p13), %s652_s4, 1024, %s660_s6, %s662_s8, %s564_s29, %s564_s29, %s565_s30  }
  0x2b   : > { %p389_p9 = scmp.ge.s32.totalorder %s561_s15, 1  ;;  %p156_p1 = scmp.lt.s32.totalorder %s561_s15, 3 }
  0x2d   : > { %p157_p3 = pnand %p389_p9, %p156_p1 }
  0x2e   : > { %s686_s5 = sand.u32 (!%p157_p3), 1, %s553_s13   ;;  %p822_p6 = scmp.ne.s32.totalorder (!%p157_p3), %s818_s23, 0 }
  0x2f   : > { %160 = sbr.rel (%p157_p3) target bundleno = 417 (0x1a1), region = 32  ;;  %s390_s9 = sshll.u32 (!%p157_p3), %s686_s5, 6 }
  0x30   : > { %s163_s10 = scalar_lea.sflag (!%p157_p3), [#allocation3], %s686_s5  ;;  %s166_s11 = scalar_lea.vmem (!%p157_p3), [#allocation2], %s390_s9 }
  0x34   : > { %540 = dma.done.wait (%p822_p6), %s163_s10, 1024  }
  0x35   : > { %542 = vsyncadd (%p822_p6), %s163_s10, 4294966272  ;;  %v696_v0 = vld [vmem:[%s166_s11] sm:$0xff]  ;;  %v698_v1 = vld [vmem:[%s166_s11 + $0x8] sm:$0xff]  ;;  %vm221_vm0 = vcmask 15360   ;;  %s402_s23 = sshll.u32 %s610_s16, 10  ;;  %s188_s4 = scalar_lea.vmem [#allocation5], %s390_s9 }
  0x36   : > { %v700_v2 = vld [vmem:[%s166_s11 + $0x20] sm:$0xff]  ;;  %v197_v3 = vadd.f32 %v698_v1, %v696_v0  ;;  %v704_v4 = vld [vmem:[%s166_s11 + $0x28] sm:$0xff]  ;;  %v706_v5 = vld [vmem:[%s166_s11 + $0x10] sm:$0xff]  ;;  %s310_s6 = sshll.u32 %s188_s4, 4  ;;  %s764_s17 = scalar_lea.hbm %s814_s3, %s402_s23  ;;  %s766_s6 = int_to_ptr.vmem [resolvable:$true] %s310_s6 }
  0x37   : > { %v708_v6 = vld [vmem:[%s166_s11 + $0x18] sm:$0xff]  ;;  %v203_v7 = vadd.f32 %v704_v4, %v700_v2  ;;  %v712_v8 = vld [vmem:[%s166_s11 + $0x30] sm:$0xff]  ;;  %v213_v15 = vld [vmem:[%s812_s1] sm:$0xff]  ;;  %s297_s16 = scalar_lea.sflag [#allocation4], %s686_s5  ;;  %s497_s9 = scalar_lea.vmem %s766_s6, 1024 }
  0x38   : > { %v714_v9 = vld [vmem:[%s166_s11 + $0x38] sm:$0xff]  ;;  %198 = vadd.xlane.f32.xlu0 %v197_v3  ;;  %v200_v10 = vadd.f32 %v708_v6, %v706_v5  ;;  %v215_v17 = vld [vmem:[%s812_s1 + $0x10] sm:$0xff]  ;;  %v214_v18 = vld [vmem:[%s812_s1 + $0x8] sm:$0xff]  ;;  %p498_p11 = scmp.ne.s32.totalorder %s766_s6, %s497_s9  ;;  %p823_p12 = scmp.ne.s32.totalorder %s819_s24, 0 }
  0x39   : > { %204 = vadd.xlane.f32.xlu1 %v203_v7  ;;  %v206_v11 = vadd.f32 %v714_v9, %v712_v8  ;;  %v216_v22 = vld [vmem:[%s812_s1 + $0x18] sm:$0xff]  ;;  %v237_v41 = vld [vmem:[%s813_s2 + $0x8] sm:$0xff]  ;;  %v236_v42 = vld [vmem:[%s813_s2] sm:$0xff]  ;;  %s566_s19 = smov [#allocation5]  }
  0x3a   : > { %v239_v44 = vld [vmem:[%s813_s2 + $0x18] sm:$0xff]  ;;  %v238_v45 = vld [vmem:[%s813_s2 + $0x10] sm:$0xff]  ;;  %p499_p13 = pnand %p498_p11, %p823_p12  ;;  %s501_s20 = sshll.u32 %s566_s19, 4  ;;  %s502_s20 = int_to_ptr.vmem [resolvable:$false] %s501_s20 }
  0x3b   : > { %s503_s22 = scalar_lea.vmem %s502_s20, 2048  ;;  %p504_p5 = scmp.lt.s32.totalorder %s766_s6, %s502_s20 }
  0x3c   : > { %201 = vadd.xlane.f32.xlu0 %v200_v10  ;;  %p500_p4 = pneg %p499_p13  ;;  %p505_p7 = scmp.lt.s32.totalorder %s503_s22, %s497_s9 }
  0x3d   : > { %207 = vadd.xlane.f32.xlu1 %v206_v11 }
  0x3e   : > { %p506_p8 = por %p505_p7, %p504_p5 }
  0x40   : > { %p507_p10 = pnand %p506_p8, %p500_p4 }
  0xc1   : > { %v199_v12 = vpop.xlane.xlu0 %198 }
  0xc2   : > { %v209_v13 = vmul.f32 0.00390625, %v199_v12  ;;  %v205_v14 = vpop.xlane.xlu1 %204 }
  0xc3   : > { %v211_v16 = vmul.f32 0.00390625, %v205_v14 }
  0xc4   : > { %v217_v20 = vmul.f32 %v213_v15, %v209_v13 }
  0xc5   : > { %v202_v19 = vpop.xlane.xlu0 %201  ;;  %v219_v25 = vmul.f32 %v215_v17, %v211_v16 }
  0xc6   : > { %v210_v21 = vmul.f32 0.00390625, %v202_v19  ;;  %v208_v23 = vpop.xlane.xlu1 %207  ;;  %v222_v28 = vsel %vm221_vm0, %v217_v20, 0.0 }
  0xc7   : > { %v212_v24 = vmul.f32 0.00390625, %v208_v23  ;;  %v225_v31 = vsel %vm221_vm0, %v219_v25, 0.0 }
  0xc8   : > { %v218_v26 = vmul.f32 %v214_v18, %v210_v21 }
  0xc9   : > { %v220_v27 = vmul.f32 %v216_v22, %v212_v24 }
  0xca   : > { %v223_v29 = vsel %vm221_vm0, %v218_v26, 0.0 }
  0xcb   : > { %v224_v30 = vadd.f32 %v223_v29, %v222_v28  ;;  %v227_v32 = vsel %vm221_vm0, %v220_v27, 0.0 }
  0xcd   : > { %v226_v33 = vadd.f32 %v225_v31, %v224_v30 }
  0xcf   : > { %v228_v34 = vadd.f32 %v227_v32, %v226_v33 }
  0xd1   : > { %v229_v35 = vrot.slane %v228_v34, 4 }
  0xd3   : > { %v230_v36 = vadd.f32 %v229_v35, %v228_v34 }
  0xd5   : > { %v231_v37 = vrot.slane %v230_v36, 2 }
  0xd7   : > { %v232_v38 = vadd.f32 %v231_v37, %v230_v36 }
  0xd9   : > { %v233_v39 = vrot.slane %v232_v38, 1 }
  0xdb   : > { %v234_v40 = vadd.f32 %v233_v39, %v232_v38 }
  0xdd   : > { %v235_v43 = vmax.f32 %v234_v40, 0.0 }
  0xdf   : > { %v241_v46 = vmul.f32 %v237_v41, %v235_v43  ;;  %v240_v47 = vmul.f32 %v236_v42, %v235_v43  ;;  %v243_v50 = vmul.f32 %v239_v44, %v235_v43  ;;  %v242_v51 = vmul.f32 %v238_v45, %v235_v43 }
  0xe1   : > { %v247_v48 = vsel %vm221_vm0, %v241_v46, 0.0  ;;  %v244_v49 = vsel %vm221_vm0, %v240_v47, 0.0  ;;  %v253_v52 = vsel %vm221_vm0, %v243_v50, 0.0  ;;  %v250_v53 = vsel %vm221_vm0, %v242_v51, 0.0 }
  0xe2   : > { %248 = vadd.xlane.f32.xlu1 %v247_v48  ;;  %245 = vadd.xlane.f32.xlu0 %v244_v49 }
  0xe6   : > { %254 = vadd.xlane.f32.xlu1 %v253_v52  ;;  %251 = vadd.xlane.f32.xlu0 %v250_v53 }
 0x16b   : > { %v249_v54 = vpop.xlane.xlu1 %248  ;;  %v246_v55 = vpop.xlane.xlu0 %245 }
 0x16c   : > { %v393_v56 = vmul.f32 -1.442695, %v249_v54  ;;  %v392_v57 = vmul.f32 -1.442695, %v246_v55 }
 0x16e   : > { %453 = vpow2.f32 %v393_v56 }
 0x16f   : > { %455 = vpow2.f32 %v392_v57  ;;  %v255_v58 = vpop.xlane.xlu1 %254  ;;  %v252_v59 = vpop.xlane.xlu0 %251 }
 0x170   : > { %v395_v60 = vmul.f32 -1.442695, %v255_v58  ;;  %v394_v61 = vmul.f32 -1.442695, %v252_v59 }
 0x172   : > { %457 = vpow2.f32 %v395_v60 }
 0x173   : > { %459 = vpow2.f32 %v394_v61 }
 0x17b   : > { %v454_v62 = vpop.eup %453 }
 0x17c   : > { %v456_v63 = vpop.eup %455  ;;  %v269_v3 = vadd.f32 1.0, %v454_v62 }
 0x17d   : > { %v268_v7 = vadd.f32 1.0, %v456_v63 }
 0x17e   : > { %461 = vrcp.f32 %v269_v3 }
 0x17f   : > { %v458_v10 = vpop.eup %457  ;;  %463 = vrcp.f32 %v268_v7 }
 0x180   : > { %v460_v11 = vpop.eup %459  ;;  %v271_v12 = vadd.f32 1.0, %v458_v10 }
 0x181   : > { %v270_v13 = vadd.f32 1.0, %v460_v11 }
 0x182   : > { %465 = vrcp.f32 %v271_v12 }
 0x183   : > { %467 = vrcp.f32 %v270_v13 }
 0x18b   : > { %v462_v14 = vpop.eup %461 }
 0x18c   : > { %v464_v15 = vpop.eup %463  ;;  %v282_v16 = vmul.f32 %v462_v14, %v706_v5  ;;  %v283_v17 = vmul.f32 %v462_v14, %v708_v6 }
 0x18d   : > { %v280_v18 = vmul.f32 %v464_v15, %v696_v0  ;;  %v281_v19 = vmul.f32 %v464_v15, %v698_v1 }
 0x18e   : > { %290 = vst [vmem:[%s188_s4 + $0x10] sm:$0xff] %v282_v16  ;;  %291 = vst [vmem:[%s188_s4 + $0x18] sm:$0xff] %v283_v17 }
 0x18f   : > { %v466_v20 = vpop.eup %465  ;;  %288 = vst [vmem:[%s188_s4] sm:$0xff] %v280_v18  ;;  %289 = vst [vmem:[%s188_s4 + $0x8] sm:$0xff] %v281_v19 }
 0x190   : > { %v468_v21 = vpop.eup %467  ;;  %v286_v5 = vmul.f32 %v466_v20, %v712_v8  ;;  %v287_v6 = vmul.f32 %v466_v20, %v714_v9 }
 0x191   : > { %v284_v0 = vmul.f32 %v468_v21, %v700_v2  ;;  %v285_v1 = vmul.f32 %v468_v21, %v704_v4 }
 0x192   : > { %294 = vst [vmem:[%s188_s4 + $0x30] sm:$0xff] %v286_v5  ;;  %295 = vst [vmem:[%s188_s4 + $0x38] sm:$0xff] %v287_v6 }
 0x193   : > { %292 = vst [vmem:[%s188_s4 + $0x20] sm:$0xff] %v284_v0  ;;  %293 = vst [vmem:[%s188_s4 + $0x28] sm:$0xff] %v285_v1 }
 0x194   : > { %510 = shalt.err (!%p507_p10)
}
 0x195   : > { %s511_s26 = scalar_lea.hbm %s764_s17, 1024  ;;  %s515_s29 = scalar_lea.hbm %s814_s3, 2048 }
 0x196   : > { %p512_p0 = scmp.ne.s32.totalorder %s764_s17, %s511_s26  ;;  %p516_p1 = scmp.lt.s32.totalorder %s764_s17, %s814_s3 }
 0x197   : > { %p517_p3 = scmp.lt.s32.totalorder %s515_s29, %s511_s26 }
 0x198   : > { %p513_p2 = pnand %p512_p0, %p823_p12 }
 0x199   : > { %p518_p6 = por %p517_p3, %p516_p1 }
 0x19a   : > { %p514_p9 = pneg %p513_p2 }
 0x19c   : > { %p519_p11 = pnand %p518_p6, %p514_p9 }
 0x19e   : > { %522 = shalt.err (!%p519_p11)
}
 0x19f   : > { %s567_s11 = smov 256   ;;  %s568_s23 = smov 16  }
 0x1a0   : > { %405 = dma.vmem_to_hbm [thread:$0]  (%p823_p12), %s766_s6, 1024, %s764_s17, %s297_s16, %s567_s11, %s567_s11, %s568_s23  }
 0x1a1 PF: > { %s325_s4 = sand.u32 1, %s549_s12   ;;  %p824_p13 = scmp.ne.s32.totalorder %s820_s25, 0 }
 0x1a2   : > { %p825_p4 = scmp.ge.s32.totalorder %s561_s15, 2  ;;  %s326_s7 = scalar_lea.sflag [#allocation4], %s325_s4 }
 0x1a4   : > { %p412_p5 = pnand %p825_p4, %p824_p13 }
 0x1a6   : > { %p413_p7 = pneg %p412_p5 }
 0x1a8   : > { %544 = dma.done.wait (%p413_p7), %s326_s7, 1024  }
 0x1a9   : > { %546 = vsyncadd (%p413_p7), %s326_s7, 4294966272  ;;  %p16_p8 = scmp.ge.s32.totalorder %s614_s18, 4   ;;  %s826_s12 = smov %s553_s13 }
 0x1aa   : > { %s827_s13 = smov %s557_s14  ;;  %s828_s14 = smov %s626_s21 }
 0x1ab   : > { %s829_s15 = smov %s614_s18  ;;  %18 = sbr.rel (!%p16_p8) target bundleno = 5 (0x5), region = 77 }
 0x1b0   :  { %331 = vsyncpa [#allocation3], 1 }
 0x1b1   :  { %333 = vsyncpa [#allocation3 + $0x1], 1 }
 0x1b2   :  { %334 = vsyncpa [#allocation4], 1 }
 0x1b3   :  { %336 = vsyncpa [#allocation4 + $0x1], 1 }

</bundles_post_ra>
